<compile_context>
chip_gen: v7x
topology: tpu7x:2x2x1
jax: 0.10.0
libtpu: 0.0.40
codegen_flags: <defaults>
</compile_context>

<pallas_src>
import functools

import jax
import jax.numpy as jnp
from jax.experimental import pallas as pl
from jax.experimental.pallas import tpu as pltpu


_MAX_LANE_UNROLL = 128  # max statically-unrolled 128-lane chunks per stats block


def _vmem_capacity_bytes():
    """Physical VMEM of the current TPU generation (fallback: assume 64 MiB / v7x)."""
    try:
        info = pltpu.get_tpu_info()
        cap = getattr(info, "vmem_capacity_bytes", None)
        if cap:
            return int(cap)
    except Exception:
        pass
    return 64 * 1024 * 1024


def _largest_divisor_tile(dim, max_tile, granule):
    """Largest t dividing `dim` with t <= max_tile and t % granule == 0.
    Falls back to the full dim (always a legal block shape) if no such tile exists."""
    if dim <= max_tile:
        return dim
    t = (max_tile // granule) * granule
    while t >= granule:
        if dim % t == 0:
            return t
        t -= granule
    # TODO(synk): pad ragged dims instead of falling back to a full-extent block.
    return dim


def _divisor_tiles(dim, granule):
    """Divisors of `dim` that are multiples of `granule`, descending. Fallback [dim]."""
    cands = [d for d in range(granule, dim + 1, granule) if dim % d == 0]
    if not cands:
        return [dim]
    return sorted(cands, reverse=True)


def _pick_fused_c_tile(n, c, hw, itemsize, granule, budget_bytes, target_bytes):
    """Channel tile for the fused single-pass kernel, or None if it cannot fit VMEM."""
    cands = _divisor_tiles(c, granule)
    if c >= 2 * granule:
        # keep n_c >= 2 so v7x's two TensorCores both get channel blocks
        halved = [t for t in cands if t <= c // 2]
        if halved:
            cands = halved
    fits = []
    for t in cands:
        slab = n * t * hw * itemsize               # input block (== output block size)
        f32_tmp = 4 * t * hw * 4                   # in-kernel f32 temporaries (sum/sq/..)
        footprint = 4 * slab + f32_tmp + (2 << 20)  # 2x in + 2x out double buffers
        if footprint <= budget_bytes:
            fits.append(t)
    if not fits:
        return None
    under = [t for t in fits if n * t * hw * itemsize <= target_bytes]
    return max(under) if under else min(fits)


# ----------------------------------------------------------------------------
# FUSED kernel: stats + normalize on a resident (N, c_tile, HW) channel slab.
# ----------------------------------------------------------------------------
def _fused_bn_kernel(x_ref, gain_ref, bias_ref, o_ref, mean_ref, var_ref,
                     *, eps, inv_count, x_dtype):
    n_batch = x_ref.shape[0]

    # --- stats: VPU adds over the batch axis, a single XLU lane-reduce at the end ---
    xf = x_ref[0].astype(jnp.float32)                       # (c_tile, HW)
    s = xf
    q = xf * xf
    for n in range(1, n_batch):
        xf = x_ref[n].astype(jnp.float32)
        s = s + xf
        q = q + xf * xf
    inv = jnp.float32(inv_count)
    mean = jnp.sum(s, axis=1, keepdims=True) * inv          # (c_tile, 1)
    m2 = jnp.sum(q, axis=1, keepdims=True) * inv
    var = m2 - mean * mean                                  # biased var (matches manual_bn)
    mean_ref[...] = mean
    var_ref[...] = var

    # module semantics: mean/var cast to x dtype before fused_bn
    mean_x = mean.astype(x_dtype).astype(jnp.float32)
    var_x = var.astype(x_dtype).astype(jnp.float32)
    inv_std = jax.lax.rsqrt(jnp.maximum(var_x, 0.0) + jnp.float32(eps))   # EUP slot

    # --- normalize: out = x * scale - shift with per-(n, c) scale/shift ---
    for n in range(n_batch):
        scale = inv_std * gain_ref[n].astype(jnp.float32)   # (c_tile, 1)
        shift = mean_x * scale - bias_ref[n].astype(jnp.float32)
        o_ref[n] = (x_ref[n].astype(jnp.float32) * scale - shift).astype(o_ref.dtype)


# ----------------------------------------------------------------------------
# Two-pass fallback, kernel 1: per-channel sum / sum-of-squares over (N, H*W).
# Lane-preserving (c_tile, 128) accumulators (VPU adds); single XLU reduce at finalize.
# ----------------------------------------------------------------------------
def _stats_kernel(x_ref, mean_ref, var_ref, sum_sc, sq_sc, *, total_elems, lane_chunks):
    ni = pl.program_id(1)
    hi = pl.program_id(2)

    @pl.when(jnp.logical_and(ni == 0, hi == 0))
    def _():
        sum_sc[...] = jnp.zeros_like(sum_sc)
        sq_sc[...] = jnp.zeros_like(sq_sc)

    xb = x_ref[0].astype(jnp.float32)                       # (c_tile, hw_tile)

    if lane_chunks > 0:
        s = sum_sc[...]
        q = sq_sc[...]
        for k in range(lane_chunks):                        # static unroll, VPU adds
            xk = xb[:, k * 128:(k + 1) * 128]
            s = s + xk
            q = q + xk * xk
        sum_sc[...] = s
        sq_sc[...] = q
    else:
        # ragged / oversized lane dim: fall back to a per-block lane reduce
        sum_sc[:, 0:1] += jnp.sum(xb, axis=1, keepdims=True)
        sq_sc[:, 0:1] += jnp.sum(xb * xb, axis=1, keepdims=True)

    @pl.when(jnp.logical_and(ni == pl.num_programs(1) - 1,
                             hi == pl.num_programs(2) - 1))
    def _():
        inv_n = jnp.float32(1.0 / total_elems)
        m = jnp.sum(sum_sc[...], axis=1, keepdims=True) * inv_n
        m2 = jnp.sum(sq_sc[...], axis=1, keepdims=True) * inv_n
        mean_ref[...] = m
        var_ref[...] = m2 - m * m                           # biased var (matches manual_bn)


# ----------------------------------------------------------------------------
# Two-pass fallback, kernel 2: out = x * scale - shift (per-(n, c) side inputs).
# ----------------------------------------------------------------------------
def _norm_kernel(x_ref, scale_ref, shift_ref, o_ref):
    x = x_ref[0].astype(jnp.float32)                        # (c_tile, hw_tile)
    scale = scale_ref[0]                                    # (c_tile, 1), f32
    shift = shift_ref[0]                                    # (c_tile, 1), f32
    o_ref[0] = (x * scale - shift).astype(o_ref.dtype)


# ----------------------------------------------------------------------------
# Wrapper: myBN.forward in training mode. Returns (out, new_stored_mean,
# new_stored_var) since JAX has no in-place module buffers.
# ----------------------------------------------------------------------------
def my_bn_forward(x_nchw, gain_nc11, bias_nc11, stored_mean, stored_var,
                  eps=1e-5, momentum=0.1, force_two_pass=False):
    N, C, H, W = x_nchw.shape
    HW = H * W
    total_elems = N * HW
    dtype = x_nchw.dtype
    itemsize = x_nchw.dtype.itemsize
    granule = max(8, 32 // itemsize)        # dtype-aware sublane granule: f32 8, bf16 16, i8 32

    # Generation-aware block / VMEM budgets.
    cap = _vmem_capacity_bytes()
    if cap >= 100 * 1024 * 1024:            # v5e / v6e: 128 MiB physical VMEM
        vmem_limit = 96 * 1024 * 1024
        stats_block = 16 * 1024 * 1024      # stats pass: 2x double-buffered input
        norm_block = 16 * 1024 * 1024       # norm pass:  4x (2x in + 2x out)
        fused_budget = 80 * 1024 * 1024
        fused_target = 16 * 1024 * 1024
    else:                                   # v7x: 64 MiB physical VMEM
        vmem_limit = 48 * 1024 * 1024
        stats_block = 12 * 1024 * 1024
        norm_block = 8 * 1024 * 1024
        fused_budget = 44 * 1024 * 1024
        fused_target = 10 * 1024 * 1024

    # Pure reshapes (no data movement) — channels on sublanes, spatial on lanes.
    x3 = x_nchw.reshape(N, C, HW)
    gain3 = gain_nc11.reshape(N, C, 1)
    bias3 = bias_nc11.reshape(N, C, 1)

    fused_c = None if force_two_pass else _pick_fused_c_tile(
        N, C, HW, itemsize, granule, fused_budget, fused_target)

    if fused_c is not None:
        # ---------------- fused single-pass path (2x|x| HBM traffic) ----------------
        n_c = C // fused_c
        out3, mean, var = pl.pallas_call(
            functools.partial(_fused_bn_kernel, eps=float(eps),
                              inv_count=1.0 / total_elems, x_dtype=dtype),
            out_shape=(jax.ShapeDtypeStruct((N, C, HW), dtype),
                       jax.ShapeDtypeStruct((C, 1), jnp.float32),
                       jax.ShapeDtypeStruct((C, 1), jnp.float32)),
            grid_spec=pltpu.PrefetchScalarGridSpec(
                num_scalar_prefetch=0,
                grid=(n_c,),
                in_specs=[pl.BlockSpec((N, fused_c, HW), lambda ci: (0, ci, 0)),
                          pl.BlockSpec((N, fused_c, 1), lambda ci: (0, ci, 0)),
                          pl.BlockSpec((N, fused_c, 1), lambda ci: (0, ci, 0))],
                out_specs=[pl.BlockSpec((N, fused_c, HW), lambda ci: (0, ci, 0)),
                           pl.BlockSpec((fused_c, 1), lambda ci: (ci, 0)),
                           pl.BlockSpec((fused_c, 1), lambda ci: (ci, 0))]),
            compiler_params=pltpu.CompilerParams(
                dimension_semantics=("parallel",),
                vmem_limit_bytes=vmem_limit),
        )(x3, gain3, bias3)
        mean_c = mean.reshape(C)
        var_c = var.reshape(C)
    else:
        # ------------------------ two-pass fallback path ---------------------------
        c_cap = 256
        if C >= 2 * granule:
            c_cap = min(c_cap, max(granule, C // 2))   # keep n_c >= 2 for v7x megacore
        c_tile = _largest_divisor_tile(C, c_cap, granule)
        n_c = C // c_tile

        # pass 1: per-channel mean / biased var over (N, H, W)
        hw_cap_s = max(128, stats_block // max(1, c_tile * itemsize))
        hw_cap_s = min(hw_cap_s, 128 * _MAX_LANE_UNROLL)
        hw_tile_s = _largest_divisor_tile(HW, hw_cap_s, 128)
        n_hw_s = HW // hw_tile_s
        lane_chunks = (hw_tile_s // 128
                       if (hw_tile_s % 128 == 0 and hw_tile_s // 128 <= _MAX_LANE_UNROLL)
                       else 0)

        mean, var = pl.pallas_call(
            functools.partial(_stats_kernel, total_elems=total_elems,
                              lane_chunks=lane_chunks),
            out_shape=(jax.ShapeDtypeStruct((C, 1), jnp.float32),
                       jax.ShapeDtypeStruct((C, 1), jnp.float32)),
            grid_spec=pltpu.PrefetchScalarGridSpec(
                num_scalar_prefetch=0,
                grid=(n_c, N, n_hw_s),
                in_specs=[pl.BlockSpec((1, c_tile, hw_tile_s),
                                       lambda ci, ni, hi: (ni, ci, hi))],
                out_specs=[pl.BlockSpec((c_tile, 1), lambda ci, ni, hi: (ci, 0)),
                           pl.BlockSpec((c_tile, 1), lambda ci, ni, hi: (ci, 0))],
                scratch_shapes=[pltpu.VMEM((c_tile, 128), jnp.float32),
                                pltpu.VMEM((c_tile, 128), jnp.float32)]),
            compiler_params=pltpu.CompilerParams(
                dimension_semantics=("parallel", "arbitrary", "arbitrary"),
                vmem_limit_bytes=vmem_limit),
        )(x3)
        mean_c = mean.reshape(C)
        var_c = var.reshape(C)

        # scale/shift built once in f32 (tiny (N, C) XLA op); module casts mean/var
        # to x dtype first (semantics of manual_bn).
        mean_x32 = mean_c.astype(dtype).astype(jnp.float32)
        var_x32 = var_c.astype(dtype).astype(jnp.float32)
        gain_f = gain3.reshape(N, C).astype(jnp.float32)
        bias_f = bias3.reshape(N, C).astype(jnp.float32)
        scale = jax.lax.rsqrt(jnp.maximum(var_x32, 0.0)[None, :] + jnp.float32(eps)) * gain_f
        shift = mean_x32[None, :] * scale - bias_f
        scale3 = scale.reshape(N, C, 1)
        shift3 = shift.reshape(N, C, 1)

        # pass 2: fused scale/shift, lane-dense on H*W
        hw_cap_n = max(128, norm_block // max(1, c_tile * itemsize))
        hw_tile_n = _largest_divisor_tile(HW, hw_cap_n, 128)
        n_hw_n = HW // hw_tile_n

        out3 = pl.pallas_call(
            _norm_kernel,
            out_shape=jax.ShapeDtypeStruct((N, C, HW), dtype),
            grid_spec=pltpu.PrefetchScalarGridSpec(
                num_scalar_prefetch=0,
                grid=(N, n_c, n_hw_n),
                in_specs=[pl.BlockSpec((1, c_tile, hw_tile_n), lambda n, c, h: (n, c, h)),
                          pl.BlockSpec((1, c_tile, 1), lambda n, c, h: (n, c, 0)),
                          pl.BlockSpec((1, c_tile, 1), lambda n, c, h: (n, c, 0))],
                out_specs=pl.BlockSpec((1, c_tile, hw_tile_n), lambda n, c, h: (n, c, h))),
            compiler_params=pltpu.CompilerParams(
                dimension_semantics=("parallel", "parallel", "parallel"),
                vmem_limit_bytes=vmem_limit),
        )(x3, scale3, shift3)

    out_nchw = out3.reshape(N, C, H, W)

    # running-stat update (accumulate_standing=False branch of the module)
    mean_x = mean_c.astype(dtype)
    var_x = var_c.astype(dtype)
    new_stored_mean = stored_mean * (1.0 - momentum) + mean_x * momentum
    new_stored_var = stored_var * (1.0 - momentum) + var_x * momentum
    return out_nchw, new_stored_mean, new_stored_var


# ----------------------------------------------------------------------------
# Pure-JAX reference (mirrors manual_bn / fused_bn exactly) for verification.
# ----------------------------------------------------------------------------
def _reference(x, gain, bias, eps=1e-5):
    xf = x.astype(jnp.float32)
    m = jnp.mean(xf, axis=(0, 2, 3), keepdims=True)
    m2 = jnp.mean(xf * xf, axis=(0, 2, 3), keepdims=True)
    var = (m2 - m * m).astype(x.dtype)
    m = m.astype(x.dtype)
    scale = jax.lax.rsqrt(var + eps) * gain
    shift = m * scale - bias
    return x * scale - shift, m.reshape(-1), var.reshape(-1)


if __name__ == "__main__":
    key = jax.random.PRNGKey(0)
    kx, kg, kb = jax.random.split(key, 3)

    N, C, H, W = 2, 4, 16, 16
    x = jax.random.normal(kx, (N, C, H, W), dtype=jnp.float32)
    # gain / bias as produced by ccbn in unet_disc: per-sample, per-channel (N, C, 1, 1)
    gain = 1.0 + 0.1 * jax.random.normal(kg, (N, C, 1, 1), dtype=jnp.float32)
    bias = 0.1 * jax.random.normal(kb, (N, C, 1, 1), dtype=jnp.float32)

    stored_mean = jnp.zeros((C,), dtype=jnp.float32)
    stored_var = jnp.ones((C,), dtype=jnp.float32)

    ref_out, ref_m, ref_v = _reference(x, gain, bias)
    ref_mean = stored_mean * 0.9 + ref_m * 0.1
    ref_var = stored_var * 0.9 + ref_v * 0.1

    # Fused single-pass path (default at shapes that fit VMEM).
    out, new_mean, new_var = jax.jit(my_bn_forward)(x, gain, bias, stored_mean, stored_var)
    jax.block_until_ready((out, new_mean, new_var))
    assert out.shape == x.shape and out.dtype == x.dtype
    assert jnp.max(jnp.abs(out - ref_out)) < 1e-4, "fused: output mismatch vs reference"
    assert jnp.max(jnp.abs(new_mean - ref_mean)) < 1e-5, "fused: running mean mismatch"
    assert jnp.max(jnp.abs(new_var - ref_var)) < 1e-5, "fused: running var mismatch"

    # Two-pass fallback path (large-tensor path), forced at the same small shape.
    out2, nm2, nv2 = jax.jit(functools.partial(my_bn_forward, force_two_pass=True))(
        x, gain, bias, stored_mean, stored_var)
    jax.block_until_ready((out2, nm2, nv2))
    assert jnp.max(jnp.abs(out2 - ref_out)) < 1e-4, "two-pass: output mismatch vs reference"
    assert jnp.max(jnp.abs(nm2 - ref_mean)) < 1e-5, "two-pass: running mean mismatch"
    assert jnp.max(jnp.abs(nv2 - ref_var)) < 1e-5, "two-pass: running var mismatch"

    print("KERNEL_OK")
</pallas_src>

<mosaic_0001>
module attributes {stable_mosaic.version = 11 : i64} {
  func.func @_fused_bn_kernel(%arg0: i32, %arg1: memref<2x4x256xf32, #tpu.memory_space<vmem>>, %arg2: memref<2x4x1xf32, #tpu.memory_space<vmem>>, %arg3: memref<2x4x1xf32, #tpu.memory_space<vmem>>, %arg4: memref<2x4x256xf32, #tpu.memory_space<vmem>>, %arg5: memref<4x1xf32, #tpu.memory_space<vmem>>, %arg6: memref<4x1xf32, #tpu.memory_space<vmem>>) attributes {dimension_semantics = [#tpu.dimension_semantics<parallel>], iteration_bounds = array<i64: 1>, scalar_prefetch = 0 : i64, scratch_operands = 0 : i64, tpu.core_type = #tpu.core_type<tc>, window_params = [{transform_indices = @transform_0, window_bounds = array<i64: 2, 4, 256>}, {transform_indices = @transform_1, window_bounds = array<i64: 2, 4, 1>}, {transform_indices = @transform_2, window_bounds = array<i64: 2, 4, 1>}, {transform_indices = @transform_3, window_bounds = array<i64: 2, 4, 256>}, {transform_indices = @transform_4, window_bounds = array<i64: 4, 1>}, {transform_indices = @transform_5, window_bounds = array<i64: 4, 1>}]} {
    %c0 = arith.constant 0 : index
    %c0_0 = arith.constant 0 : index
    %c0_1 = arith.constant 0 : index
    %0 = vector.load %arg1[%c0, %c0_0, %c0_1] : memref<2x4x256xf32, #tpu.memory_space<vmem>>, vector<1x4x256xf32>
    %1 = vector.shape_cast %0 : vector<1x4x256xf32> to vector<4x256xf32>
    %2 = arith.mulf %1, %1 : vector<4x256xf32>
    %c1 = arith.constant 1 : index
    %c0_2 = arith.constant 0 : index
    %c0_3 = arith.constant 0 : index
    %3 = vector.load %arg1[%c1, %c0_2, %c0_3] : memref<2x4x256xf32, #tpu.memory_space<vmem>>, vector<1x4x256xf32>
    %4 = vector.shape_cast %3 : vector<1x4x256xf32> to vector<4x256xf32>
    %5 = arith.addf %1, %4 : vector<4x256xf32>
    %6 = arith.mulf %4, %4 : vector<4x256xf32>
    %7 = arith.addf %2, %6 : vector<4x256xf32>
    %cst = arith.constant dense<0.000000e+00> : vector<4xf32>
    %8 = vector.multi_reduction <add>, %5, %cst [1] : vector<4x256xf32> to vector<4xf32>
    %9 = vector.shape_cast %8 : vector<4xf32> to vector<4x1xf32>
    %cst_4 = arith.constant 0.001953125 : f32
    %10 = vector.broadcast %cst_4 : f32 to vector<4x1xf32>
    %11 = arith.mulf %9, %10 : vector<4x1xf32>
    %cst_5 = arith.constant dense<0.000000e+00> : vector<4xf32>
    %12 = vector.multi_reduction <add>, %7, %cst_5 [1] : vector<4x256xf32> to vector<4xf32>
    %13 = vector.shape_cast %12 : vector<4xf32> to vector<4x1xf32>
    %cst_6 = arith.constant 0.001953125 : f32
    %14 = vector.broadcast %cst_6 : f32 to vector<4x1xf32>
    %15 = arith.mulf %13, %14 : vector<4x1xf32>
    %16 = arith.mulf %11, %11 : vector<4x1xf32>
    %17 = arith.subf %15, %16 : vector<4x1xf32>
    %c0_7 = arith.constant 0 : index
    %c0_8 = arith.constant 0 : index
    %18 = vector.load %arg5[%c0_7, %c0_8] : memref<4x1xf32, #tpu.memory_space<vmem>>, vector<4x1xf32>
    tpu.vector_store %arg5[%c0_7, %c0_8], %11 {strides = array<i32>} : memref<4x1xf32, #tpu.memory_space<vmem>>, vector<4x1xf32>,
    %c0_9 = arith.constant 0 : index
    %c0_10 = arith.constant 0 : index
    %19 = vector.load %arg6[%c0_9, %c0_10] : memref<4x1xf32, #tpu.memory_space<vmem>>, vector<4x1xf32>
    tpu.vector_store %arg6[%c0_9, %c0_10], %17 {strides = array<i32>} : memref<4x1xf32, #tpu.memory_space<vmem>>, vector<4x1xf32>,
    %cst_11 = arith.constant 0.000000e+00 : f32
    %20 = vector.broadcast %cst_11 : f32 to vector<4x1xf32>
    %21 = arith.maximumf %17, %20 : vector<4x1xf32>
    %cst_12 = arith.constant 9.99999974E-6 : f32
    %22 = vector.broadcast %cst_12 : f32 to vector<4x1xf32>
    %23 = arith.addf %21, %22 : vector<4x1xf32>
    %24 = math.rsqrt %23 : vector<4x1xf32>
    %c0_13 = arith.constant 0 : index
    %c0_14 = arith.constant 0 : index
    %c0_15 = arith.constant 0 : index
    %25 = vector.load %arg2[%c0_13, %c0_14, %c0_15] : memref<2x4x1xf32, #tpu.memory_space<vmem>>, vector<1x4x1xf32>
    %26 = vector.shape_cast %25 : vector<1x4x1xf32> to vector<4x1xf32>
    %27 = arith.mulf %24, %26 : vector<4x1xf32>
    %28 = arith.mulf %11, %27 : vector<4x1xf32>
    %c0_16 = arith.constant 0 : index
    %c0_17 = arith.constant 0 : index
    %c0_18 = arith.constant 0 : index
    %29 = vector.load %arg3[%c0_16, %c0_17, %c0_18] : memref<2x4x1xf32, #tpu.memory_space<vmem>>, vector<1x4x1xf32>
    %30 = vector.shape_cast %29 : vector<1x4x1xf32> to vector<4x1xf32>
    %31 = arith.subf %28, %30 : vector<4x1xf32>
    %c0_19 = arith.constant 0 : index
    %c0_20 = arith.constant 0 : index
    %c0_21 = arith.constant 0 : index
    %32 = vector.load %arg1[%c0_19, %c0_20, %c0_21] : memref<2x4x256xf32, #tpu.memory_space<vmem>>, vector<1x4x256xf32>
    %33 = vector.shape_cast %32 : vector<1x4x256xf32> to vector<4x256xf32>
    %34 = vector.broadcast %27 : vector<4x1xf32> to vector<4x256xf32>
    %35 = arith.mulf %33, %34 : vector<4x256xf32>
    %36 = vector.broadcast %31 : vector<4x1xf32> to vector<4x256xf32>
    %37 = arith.subf %35, %36 : vector<4x256xf32>
    %c0_22 = arith.constant 0 : index
    %c0_23 = arith.constant 0 : index
    %c0_24 = arith.constant 0 : index
    %38 = vector.load %arg4[%c0_22, %c0_23, %c0_24] : memref<2x4x256xf32, #tpu.memory_space<vmem>>, vector<1x4x256xf32>
    %39 = vector.shape_cast %38 : vector<1x4x256xf32> to vector<4x256xf32>
    %40 = vector.shape_cast %37 : vector<4x256xf32> to vector<1x4x256xf32>
    tpu.vector_store %arg4[%c0_22, %c0_23, %c0_24], %40 {strides = array<i32>} : memref<2x4x256xf32, #tpu.memory_space<vmem>>, vector<1x4x256xf32>,
    %c1_25 = arith.constant 1 : index
    %c0_26 = arith.constant 0 : index
    %c0_27 = arith.constant 0 : index
    %41 = vector.load %arg2[%c1_25, %c0_26, %c0_27] : memref<2x4x1xf32, #tpu.memory_space<vmem>>, vector<1x4x1xf32>
    %42 = vector.shape_cast %41 : vector<1x4x1xf32> to vector<4x1xf32>
    %43 = arith.mulf %24, %42 : vector<4x1xf32>
    %44 = arith.mulf %11, %43 : vector<4x1xf32>
    %c1_28 = arith.constant 1 : index
    %c0_29 = arith.constant 0 : index
    %c0_30 = arith.constant 0 : index
    %45 = vector.load %arg3[%c1_28, %c0_29, %c0_30] : memref<2x4x1xf32, #tpu.memory_space<vmem>>, vector<1x4x1xf32>
    %46 = vector.shape_cast %45 : vector<1x4x1xf32> to vector<4x1xf32>
    %47 = arith.subf %44, %46 : vector<4x1xf32>
    %c1_31 = arith.constant 1 : index
    %c0_32 = arith.constant 0 : index
    %c0_33 = arith.constant 0 : index
    %48 = vector.load %arg1[%c1_31, %c0_32, %c0_33] : memref<2x4x256xf32, #tpu.memory_space<vmem>>, vector<1x4x256xf32>
    %49 = vector.shape_cast %48 : vector<1x4x256xf32> to vector<4x256xf32>
    %50 = vector.broadcast %43 : vector<4x1xf32> to vector<4x256xf32>
    %51 = arith.mulf %49, %50 : vector<4x256xf32>
    %52 = vector.broadcast %47 : vector<4x1xf32> to vector<4x256xf32>
    %53 = arith.subf %51, %52 : vector<4x256xf32>
    %c1_34 = arith.constant 1 : index
    %c0_35 = arith.constant 0 : index
    %c0_36 = arith.constant 0 : index
    %54 = vector.load %arg4[%c1_34, %c0_35, %c0_36] : memref<2x4x256xf32, #tpu.memory_space<vmem>>, vector<1x4x256xf32>
    %55 = vector.shape_cast %54 : vector<1x4x256xf32> to vector<4x256xf32>
    %56 = vector.shape_cast %53 : vector<4x256xf32> to vector<1x4x256xf32>
    tpu.vector_store %arg4[%c1_34, %c0_35, %c0_36], %56 {strides = array<i32>} : memref<2x4x256xf32, #tpu.memory_space<vmem>>, vector<1x4x256xf32>,
    return
  }
  func.func @transform_0(%arg0: i32) -> (i32, i32, i32) {
    %c0_i32 = arith.constant 0 : i32
    %c0_i32_0 = arith.constant 0 : i32
    %c0_i32_1 = arith.constant 0 : i32
    return %c0_i32, %arg0, %c0_i32_0 : i32, i32, i32
  }
  func.func @transform_1(%arg0: i32) -> (i32, i32, i32) {
    %c0_i32 = arith.constant 0 : i32
    %c0_i32_0 = arith.constant 0 : i32
    %c0_i32_1 = arith.constant 0 : i32
    return %c0_i32, %arg0, %c0_i32_0 : i32, i32, i32
  }
  func.func @transform_2(%arg0: i32) -> (i32, i32, i32) {
    %c0_i32 = arith.constant 0 : i32
    %c0_i32_0 = arith.constant 0 : i32
    %c0_i32_1 = arith.constant 0 : i32
    return %c0_i32, %arg0, %c0_i32_0 : i32, i32, i32
  }
  func.func @transform_3(%arg0: i32) -> (i32, i32, i32) {
    %c0_i32 = arith.constant 0 : i32
    %c0_i32_0 = arith.constant 0 : i32
    %c0_i32_1 = arith.constant 0 : i32
    return %c0_i32, %arg0, %c0_i32_0 : i32, i32, i32
  }
  func.func @transform_4(%arg0: i32) -> (i32, i32) {
    %c0_i32 = arith.constant 0 : i32
    %c0_i32_0 = arith.constant 0 : i32
    return %arg0, %c0_i32 : i32, i32
  }
  func.func @transform_5(%arg0: i32) -> (i32, i32) {
    %c0_i32 = arith.constant 0 : i32
    %c0_i32_0 = arith.constant 0 : i32
    return %arg0, %c0_i32 : i32, i32
  }
}

</mosaic_0001>

<bundles_post_ra>
// kernel: my_bn_forward.1
= control target key start
LH: loop header
LB: loop body
LE: loop exit
PB: predicated region body
PF: predicated region fallthrough
CT: control target
= control target key end

     0   :  { %vm27_vm0 = vcmask 1043456   ;;  %v143_v14 = vmov 0   ;;  %vm45_vm1 = vcmask 3072   ;;  %v144_v34 = vmov 839922192   ;;  %s211_s0 = inlined_call_operand.vmem [shape: f32[2,4,256], index: 0, kind: input, shape index: {}]   ;;  %s212_s4 = inlined_call_operand.vmem [shape: f32[4,1], index: 4, kind: output, shape index: {1}]   ;;  %s213_s5 = inlined_call_operand.vmem [shape: f32[4,1], index: 5, kind: output, shape index: {2}]   ;;  %s214_s1 = inlined_call_operand.vmem [shape: f32[2,4,1], index: 1, kind: input, shape index: {}]   ;;  %s215_s2 = inlined_call_operand.vmem [shape: f32[2,4,1], index: 2, kind: input, shape index: {}]   ;;  %s216_s3 = inlined_call_operand.vmem [shape: f32[2,4,256], index: 3, kind: output, shape index: {0}]  }
   0x1   :  { %v17_v0 = vld [vmem:[%s211_s0] sm:$0xff]  ;;  %v181_v1 = vld [vmem:[%s211_s0 + $0x8] sm:$0xff]  ;;  %139 = vset.pattern.permute.xlu1 %v143_v14  ;;  %140 = vset.pattern.permute.xlu0 %v143_v14  ;;  %v62_v35 = vunpack.c.l.s4 %v144_v34  ;;  %v64_v36 = vlaneseq }
   0x2   :  { %v21_v2 = vadd.f32 %v181_v1, %v17_v0  ;;  %v22_v3 = vmul.f32 %v181_v1, %v181_v1  ;;  %v18_v4 = vmul.f32 %v17_v0, %v17_v0  ;;  %v51_v23 = vld [vmem:[%s214_s1] sm:$0xf]  ;;  %v133_v24 = vld [vmem:[%s214_s1 + $0x4] sm:$0xf] }
   0x3   :  { %v54_v28 = vld [vmem:[%s215_s2] sm:$0xf]  ;;  %v134_v32 = vld [vmem:[%s215_s2 + $0x4] sm:$0xf]  ;;  %v63_v37 = vunpack.c.0.s8 %v62_v35  ;;  %v65_v38 = vshrl.u32 %v64_v36, 7 }
   0x4   :  { %v25_v5 = vcombine.high %v21_v2, %v21_v2  ;;  %v28_v6 = vsel %vm27_vm0, %v21_v2, 0.0  ;;  %v23_v7 = vadd.f32 %v22_v3, %v18_v4 }
   0x5   :  { %v66_v39 = vsub.s32 %v63_v37, %v65_v38 }
   0x6   :  { %v29_v8 = vsel %vm27_vm0, %v25_v5, 0.0  ;;  %v35_v9 = vcombine.high %v23_v7, %v23_v7  ;;  %v37_v10 = vsel %vm27_vm0, %v23_v7, 0.0 }
   0x7   :  { %v30_v11 = vadd.f32 %v29_v8, %v28_v6 }
   0x8   :  { %v38_v12 = vsel %vm27_vm0, %v35_v9, 0.0 }
   0x9   :  { %31 = vadd.xlane.f32.xlu0 %v30_v11  ;;  %v39_v13 = vadd.f32 %v38_v12, %v37_v10 }
   0xd   :  { %40 = vadd.xlane.f32.xlu0 %v39_v13 }
  0x96   :  { %v32_v15 = vpop.xlane.xlu0 %31 }
  0x97   :  { %v33_v16 = vmul.f32 0.001953125, %v32_v15 }
  0x99   :  { %46 = vst.msk [vmem:[%s212_s4] sm:$0xf] %vm45_vm1, %v33_v16  ;;  %v43_v18 = vmul.f32 %v33_v16, %v33_v16 }
  0x9a   :  { %v41_v17 = vpop.xlane.xlu0 %40 }
  0x9b   :  { %v42_v19 = vmul.f32 0.001953125, %v41_v17 }
  0x9d   :  { %v44_v20 = vsub.f32 %v42_v19, %v43_v18 }
  0x9f   :  { %47 = vst.msk [vmem:[%s213_s5] sm:$0xf] %vm45_vm1, %v44_v20  ;;  %v48_v21 = vmax.f32 %v44_v20, 0.0 }
  0xa1   :  { %v49_v22 = vadd.f32 1e-05, %v48_v21 }
  0xa3   :  { %141 = vrsqrt.f32 %v49_v22 }
  0xad   :  { %v142_v25 = vpop.eup %141 }
  0xae   :  { %v52_v26 = vmul.f32 %v142_v25, %v51_v23  ;;  %v86_v27 = vmul.f32 %v142_v25, %v133_v24 }
  0xb0   :  { %59 = vperm.xlu1 %139, %v52_v26   ;;  %v53_v29 = vmul.f32 %v52_v26, %v33_v16  ;;  %v87_v31 = vmul.f32 %v86_v27, %v33_v16 }
  0xb2   :  { %v55_v30 = vsub.f32 %v53_v29, %v54_v28  ;;  %v90_v33 = vsub.f32 %v87_v31, %v134_v32 }
  0xb4   :  { %94 = vperm.xlu1 %139, %v86_v27   ;;  %72 = vperm.xlu0 %140, %v55_v30  }
  0xb8   :  { %107 = vperm.xlu1 %139, %v90_v33  }
 0x12f   :  { %v60_v40 = vpop.permute.xlu1 %59 }
 0x130   :  { %v67_v41 = vrot.slane %v60_v40, %v66_v39 }
 0x132   :  { %v69_v44 = vmul.f32 %v67_v41, %v17_v0 }
 0x133   :  { %v95_v42 = vpop.permute.xlu1 %94  ;;  %v73_v43 = vpop.permute.xlu0 %72 }
 0x134   :  { %v102_v45 = vrot.slane %v95_v42, %v66_v39  ;;  %v80_v46 = vrot.slane %v73_v43, %v66_v39 }
 0x136   :  { %v82_v47 = vsub.f32 %v69_v44, %v80_v46  ;;  %v104_v49 = vmul.f32 %v181_v1, %v102_v45 }
 0x137   :  { %v108_v48 = vpop.permute.xlu1 %107 }
 0x138   :  { %83 = vst [vmem:[%s216_s3] sm:$0xff] %v82_v47  ;;  %v115_v50 = vrot.slane %v108_v48, %v66_v39 }
 0x13a   :  { %v117_v51 = vsub.f32 %v104_v49, %v115_v50 }
 0x13c   :  { %136 = vst [vmem:[%s216_s3 + $0x8] sm:$0xff] %v117_v51 }

</bundles_post_ra>
